<compile_context>
chip_gen: v5e
topology: v5e:2x2
jax: 0.10.0
libtpu: 0.0.40
codegen_flags: <defaults>
</compile_context>

<pallas_src>
import jax
import jax.numpy as jnp
from jax import lax
from jax.experimental import pallas as pl
from jax.experimental.pallas import tpu as pltpu

EPS = 1e-5


def _ln_body(x_ref, w_ref, b_ref, o_ref):
    # x_ref: (tm, D) tile; w_ref / b_ref: (1, D) params (full block, resident).
    inv_d = jnp.float32(1.0 / x_ref.shape[-1])
    x = x_ref[...].astype(jnp.float32)

    # Two-pass statistics (PyTorch formulation): mean first, then the variance
    # of the centered values.  All accumulation in f32.
    mean = jnp.sum(x, axis=-1, keepdims=True) * inv_d
    d = x - mean
    var = jnp.sum(d * d, axis=-1, keepdims=True) * inv_d
    inv = lax.rsqrt(var + EPS)

    y = d * inv * w_ref[...].astype(jnp.float32)  # (1, D) params broadcast
    if b_ref is not None:
        y = y + b_ref[...].astype(jnp.float32)
    o_ref[...] = y.astype(o_ref.dtype)


def _ln_kernel_bias(x_ref, w_ref, b_ref, o_ref):
    _ln_body(x_ref, w_ref, b_ref, o_ref)


def _ln_kernel_nobias(x_ref, w_ref, o_ref):
    _ln_body(x_ref, w_ref, None, o_ref)


def _vmem_capacity_bytes():
    try:
        return int(pltpu.get_tpu_info().vmem_capacity_bytes)
    except Exception:
        return 64 * 1024 * 1024  # conservative fallback (v7x per-TC VMEM)


def _num_tensorcores():
    """Best-effort TensorCore-per-chip count (2 only on v7x)."""
    info = None
    try:
        info = pltpu.get_tpu_info()
    except Exception:
        pass
    for attr in ("num_cores", "core_count", "num_tensorcores", "tensorcore_count"):
        v = getattr(info, attr, None)
        if isinstance(v, int) and v > 0:
            return v
    try:
        kind = jax.devices()[0].device_kind.lower()
        if "v7" in kind or "7x" in kind:
            return 2
    except Exception:
        pass
    return 1


def _pick_tile_rows(rows, D, in_itemsize, out_itemsize, vmem_cap, num_tc):
    """Largest sublane-pack-aligned row tile under a realistic VMEM model.

    Footprint per tile row: double-buffered input + output pipeline buffers
    plus ~one f32 working copy in the body, charged against ~55% of physical
    VMEM.  A bytes-based cap (not a fixed row count) keeps each DMA large.
    """
    pack = max(8, 32 // in_itemsize)  # 8 for f32, 16 for bf16, 32 for 8-bit

    per_row = 2 * D * in_itemsize + 2 * D * out_itemsize + D * 4
    budget = int(vmem_cap * 0.55)
    tm = budget // max(per_row, 1)

    # Cap each input pipeline buffer: ~8 MiB on 128 MiB chips, ~4 MiB on v7x.
    buf_target = (8 << 20) if vmem_cap >= (96 << 20) else (4 << 20)
    tm = min(tm, max(pack, buf_target // max(D * in_itemsize, 1)))

    # Only 2-TC chips (v7x) benefit from splitting rows across grid steps;
    # single-TC v5e/v6e run the grid serially, so keep the biggest tile there.
    if num_tc >= 2 and rows > pack:
        tm8 = pl.cdiv(pl.cdiv(rows, 8), pack) * pack  # >= 8 steps (>= 4/core)
        if tm8 >= 512:
            tm = min(tm, tm8)
        elif rows >= 2 * pack:                        # else at least 1 step/core
            tm = min(tm, pl.cdiv(pl.cdiv(rows, 2), pack) * pack)

    if tm >= rows:
        return rows  # single block equal to the full array: always layout-legal
    tm = max(pack, (tm // pack) * pack)  # sublane-pack aligned

    # Prefer an even step count on 2-TC chips (balanced core load).
    if num_tc >= 2:
        steps = pl.cdiv(rows, tm)
        if steps > 1 and steps % 2 == 1:
            tm_even = pl.cdiv(pl.cdiv(rows, steps + 1), pack) * pack
            if pack <= tm_even < rows:
                tm = tm_even
    return tm


def layer_norm(x, weight, bias=None):
    """LayerNorm over the last dim of x, matching F.layer_norm(x, (D,), w, b, 1e-5).

    For production shapes D should be a multiple of 128 (lane-dense stores).
    """
    orig_shape = x.shape
    D = orig_shape[-1]
    rows = 1
    for s in orig_shape[:-1]:
        rows *= s
    x2 = x.reshape(rows, D)

    in_itemsize = jnp.dtype(x.dtype).itemsize
    out_itemsize = in_itemsize
    vmem_cap = _vmem_capacity_bytes()
    num_tc = _num_tensorcores()

    tm = _pick_tile_rows(rows, D, in_itemsize, out_itemsize, vmem_cap, num_tc)

    # Ragged final block: no jnp.pad / out[:rows] round trip (each costs a full
    # extra HBM read+write of the tensor).  Pallas clips the partial last
    # block's stores; OOB input rows are garbage but every op is row-local.
    grid = (pl.cdiv(rows, tm),)

    x_spec = pl.BlockSpec((tm, D), lambda i: (i, 0))
    p_spec = pl.BlockSpec((1, D), lambda i: (0, 0))
    out_spec = pl.BlockSpec((tm, D), lambda i: (i, 0))

    if bias is not None:
        kernel = _ln_kernel_bias
        inputs = (x2, weight.reshape(1, D), bias.reshape(1, D))
        in_specs = [x_spec, p_spec, p_spec]
    else:
        kernel = _ln_kernel_nobias
        inputs = (x2, weight.reshape(1, D))
        in_specs = [x_spec, p_spec]

    # Scoped-VMEM limit sized to the pipeline buffers + working set with ~50%
    # headroom, capped below physical capacity.
    est = (2 * tm * D * in_itemsize        # double-buffered input
           + 2 * tm * D * out_itemsize     # double-buffered output
           + 2 * tm * D * 4                # f32 working copies in the body
           + 4 * len(in_specs) * D * 4)    # params + casts
    vmem_limit = int(min(vmem_cap * 0.9, max(est * 3 // 2, 32 << 20)))

    cost = pl.CostEstimate(
        flops=7 * rows * D,
        transcendentals=rows,
        bytes_accessed=rows * D * (in_itemsize + out_itemsize) + 2 * D * in_itemsize,
    )

    out = pl.pallas_call(
        kernel,
        out_shape=jax.ShapeDtypeStruct((rows, D), x.dtype),
        grid_spec=pltpu.PrefetchScalarGridSpec(
            num_scalar_prefetch=0,
            grid=grid,
            in_specs=in_specs,
            out_specs=out_spec,
        ),
        compiler_params=pltpu.CompilerParams(
            dimension_semantics=("parallel",),
            vmem_limit_bytes=vmem_limit,
        ),
        cost_estimate=cost,
    )(*inputs)

    return out.reshape(orig_shape)


def ref_layer_norm(x, weight, bias=None):
    xf = x.astype(jnp.float32)
    mean = jnp.mean(xf, axis=-1, keepdims=True)
    var = jnp.mean((xf - mean) ** 2, axis=-1, keepdims=True)
    y = (xf - mean) * lax.rsqrt(var + EPS) * weight
    if bias is not None:
        y = y + bias
    return y.astype(x.dtype)


if __name__ == "__main__":
    key = jax.random.PRNGKey(0)
    batch, seq, hidden = 2, 8, 32

    x = jax.random.normal(key, (batch, seq, hidden), dtype=jnp.float32)

    # Deterministic parameter init matching nn.Module.__init__:
    #   weight = ones(ndim), bias = zeros(ndim)  (bias=True case)
    weight = jnp.ones((hidden,), dtype=jnp.float32)
    bias = jnp.zeros((hidden,), dtype=jnp.float32)

    # bias=True path
    out = layer_norm(x, weight, bias)
    jax.block_until_ready(out)
    ref = ref_layer_norm(x, weight, bias)
    assert jnp.allclose(out, ref, atol=1e-5, rtol=1e-5), "mismatch (bias=True)"

    # bias=False path (self.bias is None) — specialized no-bias kernel
    out_nb = layer_norm(x, weight, None)
    jax.block_until_ready(out_nb)
    ref_nb = ref_layer_norm(x, weight, None)
    assert jnp.allclose(out_nb, ref_nb, atol=1e-5, rtol=1e-5), "mismatch (bias=False)"

    # Ragged row count (3*5=15 rows) exercises the partial-block path.
    x_r = jax.random.normal(jax.random.PRNGKey(1), (3, 5, hidden), dtype=jnp.float32)
    out_r = layer_norm(x_r, weight, bias)
    jax.block_until_ready(out_r)
    ref_r = ref_layer_norm(x_r, weight, bias)
    assert jnp.allclose(out_r, ref_r, atol=1e-5, rtol=1e-5), "mismatch (ragged rows)"

    print("KERNEL_OK")
</pallas_src>

<mosaic_0001>
module attributes {stable_mosaic.version = 11 : i64} {
  func.func @_ln_kernel_bias(%arg0: i32, %arg1: memref<16x32xf32, #tpu.memory_space<vmem>>, %arg2: memref<1x32xf32, #tpu.memory_space<vmem>>, %arg3: memref<1x32xf32, #tpu.memory_space<vmem>>, %arg4: memref<16x32xf32, #tpu.memory_space<vmem>>) attributes {dimension_semantics = [#tpu.dimension_semantics<parallel>], iteration_bounds = array<i64: 1>, scalar_prefetch = 0 : i64, scratch_operands = 0 : i64, tpu.core_type = #tpu.core_type<tc>, window_params = [{transform_indices = @transform_0, window_bounds = array<i64: 16, 32>}, {pipeline_mode = #tpu.pipeline_mode<synchronous>, transform_indices = @transform_1, window_bounds = array<i64: 1, 32>}, {pipeline_mode = #tpu.pipeline_mode<synchronous>, transform_indices = @transform_2, window_bounds = array<i64: 1, 32>}, {transform_indices = @transform_3, window_bounds = array<i64: 16, 32>}]} {
    %c0 = arith.constant 0 : index
    %c0_0 = arith.constant 0 : index
    %0 = vector.load %arg1[%c0, %c0_0] : memref<16x32xf32, #tpu.memory_space<vmem>>, vector<16x32xf32>
    %cst = arith.constant dense<0.000000e+00> : vector<16xf32>
    %1 = vector.multi_reduction <add>, %0, %cst [1] : vector<16x32xf32> to vector<16xf32>
    %2 = vector.shape_cast %1 : vector<16xf32> to vector<16x1xf32>
    %cst_1 = arith.constant 3.125000e-02 : f32
    %3 = vector.broadcast %cst_1 : f32 to vector<16x1xf32>
    %4 = arith.mulf %2, %3 : vector<16x1xf32>
    %5 = vector.broadcast %4 : vector<16x1xf32> to vector<16x32xf32>
    %6 = arith.subf %0, %5 : vector<16x32xf32>
    %7 = arith.mulf %6, %6 : vector<16x32xf32>
    %cst_2 = arith.constant dense<0.000000e+00> : vector<16xf32>
    %8 = vector.multi_reduction <add>, %7, %cst_2 [1] : vector<16x32xf32> to vector<16xf32>
    %9 = vector.shape_cast %8 : vector<16xf32> to vector<16x1xf32>
    %cst_3 = arith.constant 3.125000e-02 : f32
    %10 = vector.broadcast %cst_3 : f32 to vector<16x1xf32>
    %11 = arith.mulf %9, %10 : vector<16x1xf32>
    %cst_4 = arith.constant 9.99999974E-6 : f32
    %12 = vector.broadcast %cst_4 : f32 to vector<16x1xf32>
    %13 = arith.addf %11, %12 : vector<16x1xf32>
    %14 = math.rsqrt %13 : vector<16x1xf32>
    %15 = vector.broadcast %14 : vector<16x1xf32> to vector<16x32xf32>
    %16 = arith.mulf %6, %15 : vector<16x32xf32>
    %c0_5 = arith.constant 0 : index
    %c0_6 = arith.constant 0 : index
    %17 = vector.load %arg2[%c0_5, %c0_6] : memref<1x32xf32, #tpu.memory_space<vmem>>, vector<1x32xf32>
    %18 = vector.broadcast %17 : vector<1x32xf32> to vector<16x32xf32>
    %19 = arith.mulf %16, %18 : vector<16x32xf32>
    %c0_7 = arith.constant 0 : index
    %c0_8 = arith.constant 0 : index
    %20 = vector.load %arg3[%c0_7, %c0_8] : memref<1x32xf32, #tpu.memory_space<vmem>>, vector<1x32xf32>
    %21 = vector.broadcast %20 : vector<1x32xf32> to vector<16x32xf32>
    %22 = arith.addf %19, %21 : vector<16x32xf32>
    %c0_9 = arith.constant 0 : index
    %c0_10 = arith.constant 0 : index
    %23 = vector.load %arg4[%c0_9, %c0_10] : memref<16x32xf32, #tpu.memory_space<vmem>>, vector<16x32xf32>
    tpu.vector_store %arg4[%c0_9, %c0_10], %22 {strides = array<i32>} : memref<16x32xf32, #tpu.memory_space<vmem>>, vector<16x32xf32>,
    return
  }
  func.func @transform_0(%arg0: i32) -> (i32, i32) {
    %c0_i32 = arith.constant 0 : i32
    %c0_i32_0 = arith.constant 0 : i32
    return %arg0, %c0_i32 : i32, i32
  }
  func.func @transform_1(%arg0: i32) -> (i32, i32) {
    %c0_i32 = arith.constant 0 : i32
    %c0_i32_0 = arith.constant 0 : i32
    %c0_i32_1 = arith.constant 0 : i32
    return %c0_i32, %c0_i32_0 : i32, i32
  }
  func.func @transform_2(%arg0: i32) -> (i32, i32) {
    %c0_i32 = arith.constant 0 : i32
    %c0_i32_0 = arith.constant 0 : i32
    %c0_i32_1 = arith.constant 0 : i32
    return %c0_i32, %c0_i32_0 : i32, i32
  }
  func.func @transform_3(%arg0: i32) -> (i32, i32) {
    %c0_i32 = arith.constant 0 : i32
    %c0_i32_0 = arith.constant 0 : i32
    return %arg0, %c0_i32 : i32, i32
  }
}

</mosaic_0001>

<bundles_post_ra>
// kernel: tpu_custom_call.1
= control target key start
LH: loop header
LB: loop body
LE: loop exit
PB: predicated region body
PF: predicated region fallthrough
CT: control target
= control target key end

     0   :  { %8 = vsyncpa [#allocation3], 0  ;;  %s264_s0 = inlined_call_operand.hbm [shape: f32[16,32], index: 0, kind: input, shape index: {}]   ;;  %s265_s1 = inlined_call_operand.hbm [shape: f32[1,32], index: 1, kind: input, shape index: {}]   ;;  %s266_s2 = inlined_call_operand.vmem [shape: f32[1,32], index: 2, kind: input, shape index: {}]   ;;  %s267_s3 = inlined_call_operand.hbm [shape: f32[16,32], index: 3, kind: output, shape index: {}]  }
   0x1   :  { %9 = vsyncpa [#allocation6], 0 }
   0x2   :  { %10 = vsyncpa [#allocation4], 0  ;;  %s15_s14 = sshll.u32 %s264_s0, 4  ;;  %s215_s15 = smov [#allocation2]   ;;  %s16_s14 = int_to_ptr.hbm [resolvable:$true] %s15_s14 }
   0x3   :  { %s17_s16 = sshll.u32 %s215_s15, 4  ;;  %s29_s19 = sshll.u32 %s265_s1, 4  ;;  %s18_s16 = int_to_ptr.vmem [resolvable:$true] %s17_s16  ;;  %s30_s19 = int_to_ptr.hbm [resolvable:$true] %s29_s19 }
   0x4   :  { %s216_s20 = smov 128   ;;  %s217_s21 = smov 8  }
   0x5   :  { %23 = dma.hbm_to_vmem [thread:$0]  %s16_s14, 256, %s18_s16, [#allocation3], %s216_s20, %s216_s20, %s217_s21  }
   0x6   :  { %s218_s22 = smov [#allocation5]  }
   0x7   :  { %s31_s23 = sshll.u32 %s218_s22, 4  ;;  %s32_s23 = int_to_ptr.vmem [resolvable:$true] %s31_s23 }
   0x8   :  { %34 = dma.hbm_to_vmem [thread:$0]  %s30_s19, 16, %s32_s23, [#allocation6]  }
   0x9   :  { %209 = dma.done.wait [#allocation3], 256  }
   0xa   :  { %210 = vsyncadd [#allocation3], 4294967040 }
   0xb   :  { %211 = dma.done.wait [#allocation6], 16  }
   0xc   :  { %212 = vsyncadd [#allocation6], 4294967280  ;;  %vm47_vm0 = vcmask 261120   ;;  %v45_v0 = vld [vmem:[#allocation2] sm:$0xff]  ;;  %v46_v2 = vld [vmem:[#allocation2 + $0x8] sm:$0xff]  ;;  %s219_s24 = smov [#allocation7]  }
   0xd   :  { %v48_v1 = vsel %vm47_vm0, %v45_v0, 0.0  ;;  %v51_v3 = vsel %vm47_vm0, %v46_v2, 0.0  ;;  %v131_v28 = vld [vmem:[#allocation5] ss:$0 sm:$0xff]  ;;  %v132_v32 = vld [vmem:[%s266_s2] ss:$0 sm:$0xff] }
   0xe   :  { %49 = vadd.xlane.f32.xlu0 %v48_v1  ;;  %s110_s25 = sshll.u32 %s219_s24, 4  ;;  %s112_s28 = sshll.u32 %s267_s3, 4  ;;  %s111_s25 = int_to_ptr.vmem [resolvable:$true] %s110_s25  ;;  %s113_s28 = int_to_ptr.hbm [resolvable:$true] %s112_s28 }
  0x16   :  { %52 = vadd.xlane.f32.xlu0 %v51_v3 }
  0x81   :  { %v50_v4 = vpop.xlane.xlu0 %49 }
  0x82   :  { %v54_v5 = vmul.f32 0.03125, %v50_v4 }
  0x84   :  { %v56_v6 = vsub.f32 %v45_v0, %v54_v5 }
  0x86   :  { %v58_v7 = vmul.f32 %v56_v6, %v56_v6 }
  0x88   :  { %v60_v8 = vsel %vm47_vm0, %v58_v7, 0.0 }
  0x89   :  { %61 = vadd.xlane.f32.xlu1 %v60_v8  ;;  %v53_v9 = vpop.xlane.xlu0 %52 }
  0x8a   :  { %v55_v10 = vmul.f32 0.03125, %v53_v9 }
  0x8c   :  { %v57_v11 = vsub.f32 %v46_v2, %v55_v10 }
  0x8e   :  { %v59_v12 = vmul.f32 %v57_v11, %v57_v11 }
  0x90   :  { %v63_v13 = vsel %vm47_vm0, %v59_v12, 0.0 }
  0x91   :  { %64 = vadd.xlane.f32.xlu1 %v63_v13 }
  0xfc   :  { %v62_v14 = vpop.xlane.xlu1 %61 }
  0xfd   :  { %v66_v15 = vmul.f32 0.03125, %v62_v14 }
  0xff   :  { %v68_v16 = vadd.f32 1e-05, %v66_v15 }
 0x101   :  { %133 = vrsqrt.f32 %v68_v16  ;;  %vm76_vm2 = vweird.f32 %v68_v16 }
 0x104   :  { %v65_v17 = vpop.xlane.xlu1 %64 }
 0x105   :  { %v67_v18 = vmul.f32 0.03125, %v65_v17 }
 0x107   :  { %v134_v19 = vpop.eup %133  ;;  %v69_v20 = vadd.f32 1e-05, %v67_v18 }
 0x108   :  { %v71_v21 = vmul.f32 %v134_v19, %v68_v16  ;;  %vm77_vm1 = vweird.f32 %v134_v19 }
 0x109   :  { %135 = vrsqrt.f32 %v69_v20  ;;  %vm78_vm3 = vmor %vm76_vm2, %vm77_vm1  ;;  %vm86_vm5 = vweird.f32 %v69_v20 }
 0x10a   :  { %v72_v22 = vmul.f32 %v134_v19, %v71_v21 }
 0x10c   :  { %v73_v23 = vmul.f32 0.5, %v72_v22 }
 0x10e   :  { %v74_v24 = vsub.f32 1.5, %v73_v23 }
 0x10f   :  { %v136_v25 = vpop.eup %135 }
 0x110   :  { %v75_v26 = vmul.f32 %v134_v19, %v74_v24  ;;  %v81_v27 = vmul.f32 %v136_v25, %v69_v20  ;;  %vm87_vm4 = vweird.f32 %v136_v25 }
 0x111   :  { %vm88_vm6 = vmor %vm86_vm5, %vm87_vm4 }
 0x112   :  { %v79_v29 = vsel %vm78_vm3, %v134_v19, %v75_v26  ;;  %v82_v30 = vmul.f32 %v136_v25, %v81_v27 }
 0x113   :  { %v90_v31 = vmul.f32 %v79_v29, %v56_v6 }
 0x114   :  { %v83_v33 = vmul.f32 0.5, %v82_v30 }
 0x115   :  { %v96_v34 = vmul.f32 %v131_v28, %v90_v31 }
 0x116   :  { %v84_v35 = vsub.f32 1.5, %v83_v33 }
 0x117   :  { %v102_v36 = vadd.f32 %v132_v32, %v96_v34 }
 0x118   :  { %v85_v37 = vmul.f32 %v136_v25, %v84_v35 }
 0x119   :  { %104 = vst.msk [vmem:[#allocation7] sm:$0xff] %vm47_vm0, %v102_v36 }
 0x11a   :  { %v89_v38 = vsel %vm88_vm6, %v136_v25, %v85_v37 }
 0x11b   :  { %v91_v39 = vmul.f32 %v89_v38, %v57_v11 }
 0x11d   :  { %v97_v40 = vmul.f32 %v131_v28, %v91_v39 }
 0x11f   :  { %v103_v41 = vadd.f32 %v132_v32, %v97_v40 }
 0x121   :  { %105 = vst.msk [vmem:[#allocation7 + $0x8] sm:$0xff] %vm47_vm0, %v103_v41 }
 0x122   :  { %118 = dma.vmem_to_hbm [thread:$0]  %s111_s25, 256, %s113_s28, [#allocation4], %s216_s20, %s216_s20, %s217_s21  }
 0x123   :  { %213 = dma.done.wait [#allocation4], 256  }
 0x124   :  { %214 = vsyncadd [#allocation4], 4294967040 }
 0x125   :  { %123 = vsyncpa [#allocation3], 1 }
 0x126   :  { %124 = vsyncpa [#allocation6], 1 }
 0x127   :  { %125 = vsyncpa [#allocation4], 1 }

</bundles_post_ra>
